<compile_context>
chip_gen: v7x
topology: tpu7x:2x2x1
jax: 0.10.0
libtpu: 0.0.40
codegen_flags: <defaults>
</compile_context>

<pallas_src>
import functools

import jax
import jax.numpy as jnp
from jax import lax
from jax.experimental import pallas as pl
from jax.experimental.pallas import tpu as pltpu

_LANE = 128


def _round_down(a: int, b: int) -> int:
    return (a // b) * b


def _vmem_limit_bytes() -> int:
    """Generation-aware scoped-VMEM budget: 75% of physical VMEM, >= 16 MiB.

    v7x: 64 MiB physical -> ~48 MiB; v5e/v6e: 128 MiB -> ~96 MiB.  Falls back to the
    v7x-safe 48 MiB if the hardware query is unavailable.
    """
    phys = 64 * 1024 * 1024
    try:
        info = pltpu.get_tpu_info()
        for name in ("vmem_capacity_bytes", "vmem_size_bytes", "vmem_bytes"):
            val = getattr(info, name, None)
            if val:
                phys = int(val)
                break
    except Exception:
        pass
    return max(16 * 1024 * 1024, (phys * 3) // 4)


# ----------------------------- fused single-pass kernel -----------------------------
def _fused_se_kernel(x_ref, w1_ref, w2_ref, o_ref, *, inv_hw):
    """One grid step = one batch image: pool + excitation FC + scale (1 read + 1 write of x)."""
    x = x_ref[0]                                                              # (C, HW)
    pooled = jnp.sum(x.astype(jnp.float32), axis=1, keepdims=True) * inv_hw   # (C, 1)
    # Excitation with channels kept on the sublane axis (PyTorch weight orientation).
    h = jnp.maximum(
        jnp.dot(w1_ref[...], pooled, preferred_element_type=jnp.float32), 0.0)   # (Ch, 1)
    gate = jax.nn.sigmoid(
        jnp.dot(w2_ref[...], h, preferred_element_type=jnp.float32))             # (C, 1)
    # f32 multiply, cast the product once (exact parity with the f32 reference for bf16 x).
    o_ref[0] = (x.astype(jnp.float32) * gate).astype(o_ref.dtype)


# --------------------------- fallback pass 1: channel sums ---------------------------
def _pool_kernel(x_ref, s_ref, acc_ref, *, hw_true, t_hw, ragged):
    """Streaming per-channel sum over HW tiles.

    acc_ref is a lane-dense (C, 128) f32 scratch: each 128-lane chunk is accumulated
    with plain VPU adds (no f32 copy of the full tile); the single cross-lane (XLU)
    reduce happens only on the last tile.  The ragged tail of a partial last tile is
    masked in-kernel (no host-side padding of x).
    """
    t = pl.program_id(1)

    @pl.when(t == 0)
    def _():
        acc_ref[...] = jnp.zeros_like(acc_ref)

    x = x_ref[0]                                                        # (C, t_hw)
    base = t * t_hw
    for k in range(t_hw // _LANE):
        chunk = x[:, k * _LANE:(k + 1) * _LANE].astype(jnp.float32)     # (C, 128)
        if ragged:  # mask out-of-bounds lanes of the (possibly partial) last tile
            col = lax.broadcasted_iota(jnp.int32, chunk.shape, 1) + (base + k * _LANE)
            chunk = jnp.where(col < hw_true, chunk, 0.0)
        acc_ref[...] += chunk

    @pl.when(t == pl.num_programs(1) - 1)
    def _():
        s_ref[0] = jnp.sum(acc_ref[...], axis=1, keepdims=True)          # (C, 1)


# --------------------------- fallback pass 2: streaming scale ---------------------------
def _scale_kernel(x_ref, g_ref, o_ref):
    # x_ref: (1, C, t_hw)   g_ref: (1, C, 1) f32   o_ref: (1, C, t_hw)
    o_ref[0] = (x_ref[0].astype(jnp.float32) * g_ref[0]).astype(o_ref.dtype)


def se_forward(x, w1, w2, *, force_two_pass: bool = False):
    """SE forward.

    x : (B, C, H, W)
    w1: (C//ratio, C)   -- fc[0].weight, PyTorch orientation
    w2: (C, C//ratio)   -- fc[2].weight, PyTorch orientation
    """
    B, C, H, W = x.shape
    Ch = w1.shape[0]
    HW = H * W
    itemsize = jnp.dtype(x.dtype).itemsize
    x_flat = x.reshape(B, C, HW)

    vmem_limit = _vmem_limit_bytes()
    slice_bytes = C * HW * itemsize
    # Fused path VMEM need: in + out blocks, double-buffered, plus weights + headroom.
    fused_need = 4 * slice_bytes + 8 * C * Ch + (1 << 20)
    hw_floor = _round_down(HW, _LANE)
    use_fused = (fused_need <= vmem_limit and not force_two_pass) or hw_floor < _LANE

    if use_fused:
        # ---------- single pass: pool + excitation + scale ----------
        out_flat = pl.pallas_call(
            functools.partial(_fused_se_kernel, inv_hw=1.0 / HW),
            out_shape=jax.ShapeDtypeStruct((B, C, HW), x.dtype),
            grid_spec=pltpu.PrefetchScalarGridSpec(
                num_scalar_prefetch=0,
                grid=(B,),
                in_specs=[
                    pl.BlockSpec((1, C, HW), lambda b: (b, 0, 0)),   # full batch slice
                    pl.BlockSpec((Ch, C), lambda b: (0, 0)),
                    pl.BlockSpec((C, Ch), lambda b: (0, 0)),
                ],
                out_specs=pl.BlockSpec((1, C, HW), lambda b: (b, 0, 0)),
            ),
            compiler_params=pltpu.CompilerParams(
                dimension_semantics=("parallel",),
                vmem_limit_bytes=int(vmem_limit),
            ),
            cost_estimate=pl.CostEstimate(
                flops=int(B * (2 * C * HW + 4 * C * Ch)),
                transcendentals=int(B * C),
                bytes_accessed=int(2 * B * C * HW * itemsize + 2 * C * Ch * 4),
            ),
        )(x_flat, w1, w2)
        return out_flat.reshape(B, C, H, W)

    # ---------- fallback: two streaming passes (batch slice too big for VMEM) ----------
    # TODO(synk): for v7x single-image inference (B=1) an extra parallel channel-block grid
    # axis on both passes would keep the 2nd TensorCore busy; omitted to keep this simple.
    block_cap = min(8 << 20, max(2 << 20, vmem_limit // 6))          # per-block byte cap
    cap_lanes = max(_LANE, _round_down(block_cap // (C * itemsize), _LANE))

    def pick_t(max_lanes):
        # multiple of 128, never exceeding the array's HW extent (ragged tail masked in-kernel)
        return max(_LANE, min(cap_lanes, max_lanes, hw_floor))

    t1 = pick_t(64 * _LANE)      # pass 1: bound the per-tile chunk unroll to <= 64
    t2 = pick_t(1 << 30)         # pass 2: pure streaming, no lane cap
    n1 = pl.cdiv(HW, t1)
    n2 = pl.cdiv(HW, t2)

    # ---- pass 1: per-channel sums (no host pad; ragged tail masked in-kernel) ----
    pooled_sum = pl.pallas_call(
        functools.partial(_pool_kernel, hw_true=HW, t_hw=t1, ragged=(HW % t1 != 0)),
        out_shape=jax.ShapeDtypeStruct((B, C, 1), jnp.float32),
        grid_spec=pltpu.PrefetchScalarGridSpec(
            num_scalar_prefetch=0,
            grid=(B, n1),
            in_specs=[pl.BlockSpec((1, C, t1), lambda b, t: (b, 0, t))],
            out_specs=pl.BlockSpec((1, C, 1), lambda b, t: (b, 0, 0)),
            scratch_shapes=[pltpu.VMEM((C, _LANE), jnp.float32)],
        ),
        compiler_params=pltpu.CompilerParams(
            dimension_semantics=("parallel", "arbitrary"),
            vmem_limit_bytes=int(vmem_limit),
        ),
        cost_estimate=pl.CostEstimate(
            flops=int(B * C * HW),
            transcendentals=0,
            bytes_accessed=int(B * C * HW * itemsize + B * C * 4),
        ),
    )(x_flat)

    # ---- excitation FC hoisted out of the streaming kernels (tiny, batched over B) ----
    pooled = pooled_sum[:, :, 0] * (1.0 / HW)                          # (B, C) f32
    h = jnp.maximum(pooled @ w1.astype(jnp.float32).T, 0.0)            # (B, Ch)
    gates = jax.nn.sigmoid(h @ w2.astype(jnp.float32).T)[:, :, None]   # (B, C, 1) f32

    # ---- pass 2: streaming scale x * gate (both grid axes parallel) ----
    out_flat = pl.pallas_call(
        _scale_kernel,
        out_shape=jax.ShapeDtypeStruct((B, C, HW), x.dtype),
        grid_spec=pltpu.PrefetchScalarGridSpec(
            num_scalar_prefetch=0,
            grid=(B, n2),
            in_specs=[
                pl.BlockSpec((1, C, t2), lambda b, t: (b, 0, t)),
                pl.BlockSpec((1, C, 1), lambda b, t: (b, 0, 0)),
            ],
            out_specs=pl.BlockSpec((1, C, t2), lambda b, t: (b, 0, t)),
        ),
        compiler_params=pltpu.CompilerParams(
            dimension_semantics=("parallel", "parallel"),
            vmem_limit_bytes=int(vmem_limit),
        ),
        cost_estimate=pl.CostEstimate(
            flops=int(B * C * HW),
            transcendentals=0,
            bytes_accessed=int(2 * B * C * HW * itemsize + B * C * 4),
        ),
    )(x_flat, gates)
    return out_flat.reshape(B, C, H, W)


def se_reference(x, w1, w2):
    """Pure-JAX reference matching the PyTorch forward (w1, w2 in PyTorch orientation)."""
    y = jnp.mean(x, axis=(2, 3))                       # adaptive avg pool -> (B, C)
    y = jnp.maximum(y @ w1.T, 0.0)                     # Linear(C, C//r, bias=False) + ReLU
    y = jax.nn.sigmoid(y @ w2.T)                       # Linear(C//r, C, bias=False) + Sigmoid
    return x * y[:, :, None, None]


if __name__ == "__main__":
    key = jax.random.PRNGKey(0)

    # SE(channel=32, ratio=16) -> hidden = 2
    C, ratio = 32, 16
    Ch = C // ratio

    k1, k2, kx1, kx2, kx3 = jax.random.split(key, 5)
    w1 = jax.random.normal(k1, (Ch, C), dtype=jnp.float32) * 0.1   # fc[0].weight
    w2 = jax.random.normal(k2, (C, Ch), dtype=jnp.float32) * 0.1   # fc[2].weight

    # 1) Fused path, 128-aligned HW (HW = 256)
    x1 = jax.random.normal(kx1, (2, C, 16, 16), dtype=jnp.float32)
    out1 = jax.block_until_ready(se_forward(x1, w1, w2))
    ref1 = se_reference(x1, w1, w2)
    assert out1.shape == x1.shape
    assert jnp.allclose(out1, ref1, atol=1e-5, rtol=1e-5), "mismatch (fused, aligned HW)"

    # 2) Fused path, non-128-aligned HW (HW = 100; block = full array dims, no pad/slice)
    x2 = jax.random.normal(kx2, (1, C, 10, 10), dtype=jnp.float32)
    out2 = jax.block_until_ready(se_forward(x2, w1, w2))
    ref2 = se_reference(x2, w1, w2)
    assert out2.shape == x2.shape
    assert jnp.allclose(out2, ref2, atol=1e-5, rtol=1e-5), "mismatch (fused, ragged HW)"

    # 3) Two-pass fallback (forced), HW = 576 with ragged tail -> exercises in-kernel masking
    x3 = jax.random.normal(kx3, (2, C, 24, 24), dtype=jnp.float32)
    out3 = jax.block_until_ready(se_forward(x3, w1, w2, force_two_pass=True))
    ref3 = se_reference(x3, w1, w2)
    assert out3.shape == x3.shape
    assert jnp.allclose(out3, ref3, atol=1e-5, rtol=1e-5), "mismatch (two-pass fallback)"

    print("KERNEL_OK")
</pallas_src>

<mosaic_0001>
module attributes {stable_mosaic.version = 11 : i64} {
  func.func @_fused_se_kernel(%arg0: i32, %arg1: memref<1x32x256xf32, #tpu.memory_space<vmem>>, %arg2: memref<2x32xf32, #tpu.memory_space<vmem>>, %arg3: memref<32x2xf32, #tpu.memory_space<vmem>>, %arg4: memref<1x32x256xf32, #tpu.memory_space<vmem>>) attributes {dimension_semantics = [#tpu.dimension_semantics<parallel>], iteration_bounds = array<i64: 2>, scalar_prefetch = 0 : i64, scratch_operands = 0 : i64, tpu.core_type = #tpu.core_type<tc>, window_params = [{transform_indices = @transform_0, window_bounds = array<i64: 1, 32, 256>}, {pipeline_mode = #tpu.pipeline_mode<synchronous>, transform_indices = @transform_1, window_bounds = array<i64: 2, 32>}, {pipeline_mode = #tpu.pipeline_mode<synchronous>, transform_indices = @transform_2, window_bounds = array<i64: 32, 2>}, {transform_indices = @transform_3, window_bounds = array<i64: 1, 32, 256>}]} {
    %c0 = arith.constant 0 : index
    %c0_0 = arith.constant 0 : index
    %c0_1 = arith.constant 0 : index
    %0 = vector.load %arg1[%c0, %c0_0, %c0_1] : memref<1x32x256xf32, #tpu.memory_space<vmem>>, vector<1x32x256xf32>
    %1 = vector.shape_cast %0 : vector<1x32x256xf32> to vector<32x256xf32>
    %cst = arith.constant dense<0.000000e+00> : vector<32xf32>
    %2 = vector.multi_reduction <add>, %1, %cst [1] : vector<32x256xf32> to vector<32xf32>
    %3 = vector.shape_cast %2 : vector<32xf32> to vector<32x1xf32>
    %cst_2 = arith.constant 3.906250e-03 : f32
    %4 = vector.broadcast %cst_2 : f32 to vector<32x1xf32>
    %5 = arith.mulf %3, %4 : vector<32x1xf32>
    %c0_3 = arith.constant 0 : index
    %c0_4 = arith.constant 0 : index
    %6 = vector.load %arg2[%c0_3, %c0_4] : memref<2x32xf32, #tpu.memory_space<vmem>>, vector<2x32xf32>
    %cst_5 = arith.constant dense<0.000000e+00> : vector<2x1xf32>
    %7 = tpu.matmul %6, %5, %cst_5 {dimension_numbers = #tpu.dot_dimension_numbers<[1], [0], [0], [1], [0, 0, 1, 1], [], []>} : vector<2x32xf32>, vector<32x1xf32>, vector<2x1xf32> -> vector<2x1xf32>
    %cst_6 = arith.constant 0.000000e+00 : f32
    %8 = vector.broadcast %cst_6 : f32 to vector<2x1xf32>
    %9 = arith.maximumf %7, %8 : vector<2x1xf32>
    %c0_7 = arith.constant 0 : index
    %c0_8 = arith.constant 0 : index
    %10 = vector.load %arg3[%c0_7, %c0_8] : memref<32x2xf32, #tpu.memory_space<vmem>>, vector<32x2xf32>
    %cst_9 = arith.constant dense<0.000000e+00> : vector<32x1xf32>
    %11 = tpu.matmul %10, %9, %cst_9 {dimension_numbers = #tpu.dot_dimension_numbers<[1], [0], [0], [1], [0, 0, 1, 1], [], []>} : vector<32x2xf32>, vector<2x1xf32>, vector<32x1xf32> -> vector<32x1xf32>
    %12 = arith.negf %11 : vector<32x1xf32>
    %13 = math.exp %12 : vector<32x1xf32>
    %cst_10 = arith.constant 1.000000e+00 : f32
    %14 = vector.broadcast %cst_10 : f32 to vector<32x1xf32>
    %15 = arith.addf %14, %13 : vector<32x1xf32>
    %16 = arith.divf %14, %15 : vector<32x1xf32>
    %17 = vector.broadcast %16 : vector<32x1xf32> to vector<32x256xf32>
    %18 = arith.mulf %1, %17 : vector<32x256xf32>
    %c0_11 = arith.constant 0 : index
    %c0_12 = arith.constant 0 : index
    %c0_13 = arith.constant 0 : index
    %19 = vector.load %arg4[%c0_11, %c0_12, %c0_13] : memref<1x32x256xf32, #tpu.memory_space<vmem>>, vector<1x32x256xf32>
    %20 = vector.shape_cast %19 : vector<1x32x256xf32> to vector<32x256xf32>
    %21 = vector.shape_cast %18 : vector<32x256xf32> to vector<1x32x256xf32>
    tpu.vector_store %arg4[%c0_11, %c0_12, %c0_13], %21 {strides = array<i32>} : memref<1x32x256xf32, #tpu.memory_space<vmem>>, vector<1x32x256xf32>,
    return
  }
  func.func @transform_0(%arg0: i32) -> (i32, i32, i32) {
    %c0_i32 = arith.constant 0 : i32
    %c0_i32_0 = arith.constant 0 : i32
    %c0_i32_1 = arith.constant 0 : i32
    return %arg0, %c0_i32, %c0_i32_0 : i32, i32, i32
  }
  func.func @transform_1(%arg0: i32) -> (i32, i32) {
    %c0_i32 = arith.constant 0 : i32
    %c0_i32_0 = arith.constant 0 : i32
    %c0_i32_1 = arith.constant 0 : i32
    return %c0_i32, %c0_i32_0 : i32, i32
  }
  func.func @transform_2(%arg0: i32) -> (i32, i32) {
    %c0_i32 = arith.constant 0 : i32
    %c0_i32_0 = arith.constant 0 : i32
    %c0_i32_1 = arith.constant 0 : i32
    return %c0_i32, %c0_i32_0 : i32, i32
  }
  func.func @transform_3(%arg0: i32) -> (i32, i32, i32) {
    %c0_i32 = arith.constant 0 : i32
    %c0_i32_0 = arith.constant 0 : i32
    %c0_i32_1 = arith.constant 0 : i32
    return %arg0, %c0_i32, %c0_i32_0 : i32, i32, i32
  }
}

</mosaic_0001>

<bundles_post_ra>
// kernel: tpu_custom_call.1
= control target key start
LH: loop header
LB: loop body
LE: loop exit
PB: predicated region body
PF: predicated region fallthrough
CT: control target
= control target key end

     0   :  { %8 = vsyncpa [#allocation3], 0  ;;  %s1016_s0 = inlined_call_operand.hbm [shape: f32[2,32,256], index: 0, kind: input, shape index: {}]   ;;  %s1017_s1 = inlined_call_operand.vmem [shape: f32[2,32], index: 1, kind: input, shape index: {}]   ;;  %s1018_s2 = inlined_call_operand.vmem [shape: f32[32,2], index: 2, kind: input, shape index: {}]   ;;  %s1019_s3 = inlined_call_operand.hbm [shape: f32[2,32,256], index: 3, kind: output, shape index: {}]  }
   0x1   :  { %10 = vsyncpa [#allocation3 + $0x1], 0 }
   0x2   :  { %11 = vsyncpa [#allocation4], 0 }
   0x3   :  { %13 = vsyncpa [#allocation4 + $0x1], 0  ;;  %s803_s12 = smov 0   ;;  %s805_s13 = smov 0  }
   0x4   :  { %s807_s14 = smov 0   ;;  %s809_s15 = smov 0  }
   0x5 LB: > { %s824_s16 = sadd.s32 4294967295, %s771_s15   ;;  %s542_s17 = sadd.s32 4294967294, %s771_s15   ;;  %s771_s15 = sphi %s809_s15, %s1032_s15   ;;  %s767_s14 = sphi %s807_s14, %s1031_s14   ;;  %s763_s13 = sphi %s805_s13, %s1030_s13   ;;  %s759_s12 = sphi %s803_s12, %s1029_s12  }
   0x6   : > { %s828_s18 = sadd.s32 1, %s771_s15   ;;  %s26_s19 = sadd.s32 1, %s767_s14 }
   0x7   : > { %s23_s20 = ssub.s32 %s771_s15, %s828_s18  ;;  %p33_p0 = scmp.ne.s32.totalorder %s767_s14, %s763_s13 }
   0x8   : > { %p24_p1 = scmp.eq.s32.totalorder %s23_s20, 0  ;;  %p34_p2 = scmp.eq.s32.totalorder %s771_s15, 0 }
   0x9   : > { %p39_p3 = scmp.ne.s32.totalorder %s763_s13, %s759_s12  ;;  %p40_p4 = scmp.eq.s32.totalorder %s824_s16, 0 }
   0xa   : > { %s840_s21 = scalar_select %p24_p1, %s767_s14, %s26_s19  }
   0xb   : > { %p842_p5 = por %p34_p2, %p33_p0  ;;  %p846_p6 = por %p40_p4, %p39_p3 }
   0xc   : > { %p105_p7 = scmp.eq.s32.totalorder %s824_s16, 1  ;;  %p111_p8 = scmp.eq.s32.totalorder %s542_s17, 1 }
   0xd   : > { %p615_p10 = scmp.lt.s32.totalorder %s771_s15, 2  ;;  %s137_s26 = sand.u32 1, %s767_s14  }
   0xe   : > { %p853_p11 = por %p105_p7, %p33_p0  ;;  %p857_p12 = por %p111_p8, %p39_p3 }
   0xf   : > { %s566_s27 = sshll.u32 %s771_s15, 10  ;;  %s545_s28 = sshll.u32 %s137_s26, 6 }
  0x10   : > { %s1023_s24 = scalar_select %p853_p11, 1, 0 }
  0x11   : > { %s1024_s25 = scalar_select %p857_p12, 1, 0 }
  0x12   : > { %s866_s4 = scalar_lea.hbm %s1016_s0, %s566_s27  ;;  %s141_s5 = scalar_lea.vmem [#allocation2], %s545_s28 }
  0x13   : > { %s148_s6 = sshll.u32 %s141_s5, 4  ;;  %p870_p13 = pnand %p615_p10, %p842_p5  ;;  %s874_s6 = int_to_ptr.vmem [resolvable:$true] %s148_s6 }
  0x14   : > { %s876_s8 = scalar_lea.sflag [#allocation3], %s137_s26  ;;  %s675_s9 = scalar_lea.hbm %s866_s4, 1024 }
  0x15   : > { %p676_p0 = scmp.ne.s32.totalorder %s866_s4, %s675_s9  ;;  %p677_p1 = pneg %p870_p13 }
  0x16   : > { %s680_s17 = scalar_lea.hbm %s1016_s0, 2048  ;;  %p681_p4 = scmp.lt.u32.totalorder %s866_s4, %s1016_s0 }
  0x17   : > { %p678_p2 = pnand %p677_p1, %p676_p0  ;;  %p682_p5 = scmp.lt.u32.totalorder %s680_s17, %s675_s9 }
  0x18   : > { %p684_p8 = scmp.lt.u32.totalorder %s675_s9, %s866_s4 }
  0x19   : > { %p679_p3 = pneg %p678_p2  ;;  %p683_p7 = por %p682_p5, %p681_p4 }
  0x1b   : > { %p685_p10 = por %p684_p8, %p683_p7 }
  0x1d   : > { %p686_p9 = pnand %p685_p10, %p679_p3 }
  0x1f   : > { %689 = shalt.err (!%p686_p9)
}
  0x20   : > { %s690_s22 = scalar_lea.vmem %s874_s6, 1024  ;;  %s773_s26 = smov [#allocation2]  }
  0x21   : > { %p691_p0 = scmp.ne.s32.totalorder %s874_s6, %s690_s22  ;;  %s695_s27 = sshll.u32 %s773_s26, 4  ;;  %s696_s27 = int_to_ptr.vmem [resolvable:$false] %s695_s27 }
  0x22   : > { %s697_s28 = scalar_lea.vmem %s696_s27, 2048  ;;  %p698_p11 = scmp.lt.s32.totalorder %s874_s6, %s696_s27 }
  0x23   : > { %p693_p2 = pnand %p691_p0, %p677_p1  ;;  %p699_p4 = scmp.lt.s32.totalorder %s697_s28, %s690_s22 }
  0x25   : > { %p694_p12 = pneg %p693_p2  ;;  %p700_p5 = por %p699_p4, %p698_p11 }
  0x27   : > { %p701_p7 = pnand %p700_p5, %p694_p12 }
  0x29   : > { %704 = shalt.err (!%p701_p7)
}
  0x2a   : > { %s774_s29 = smov 256   ;;  %s775_s30 = smov 16  }
  0x2b   : > { %610 = dma.hbm_to_vmem [thread:$0]  (!%p870_p13), %s866_s4, 1024, %s874_s6, %s876_s8, %s774_s29, %s774_s29, %s775_s30  }
  0x2c   : > { %p548_p9 = scmp.ge.s32.totalorder %s771_s15, 1  ;;  %p156_p1 = scmp.lt.s32.totalorder %s771_s15, 3 }
  0x2e   : > { %p157_p3 = pnand %p548_p9, %p156_p1 }
  0x2f   : > { %s907_s5 = sand.u32 (!%p157_p3), 1, %s763_s13  }
  0x30   : > { %160 = sbr.rel (%p157_p3) target bundleno = 825 (0x339), region = 32  ;;  %s549_s9 = sshll.u32 (!%p157_p3), %s907_s5, 6 }
  0x31   : > { %s163_s10 = scalar_lea.sflag (!%p157_p3), [#allocation3], %s907_s5  ;;  %s166_s11 = scalar_lea.vmem (!%p157_p3), [#allocation2], %s549_s9 }
  0x37   : > { %750 = dma.done.wait (%p846_p6), %s163_s10, 1024  }
  0x38   : > { %752 = vsyncadd (%p846_p6), %s163_s10, 4294966272  ;;  %v917_v0 = vld [vmem:[%s166_s11 + $0x20] sm:$0xff]  ;;  %v919_v1 = vld [vmem:[%s166_s11 + $0x28] sm:$0xff]  ;;  %v776_v12 = vmov 0.0|0.0   ;;  %vm777_vm0 = vmmov 0   ;;  %v778_v13 = vmov 0.0  }
  0x39   : > { %v921_v2 = vld [vmem:[%s166_s11] sm:$0xff]  ;;  %v203_v3 = vadd.f32 %v919_v1, %v917_v0  ;;  %v925_v4 = vld [vmem:[%s166_s11 + $0x8] sm:$0xff]  ;;  %v927_v5 = vld [vmem:[%s166_s11 + $0x30] sm:$0xff]  ;;  %597 = vmatprep.subr.bf16.mxu0 %v776_v12  ;;  %586 = vmatprep.mubr.msk.f32.mxu0 %vm777_vm0, %v778_v13  ;;  %vm214_vm1 = vcmask 261120   ;;  %vm293_vm2 = vcmask 15360   ;;  %vm306_vm3 = vcmask 1041408  }
  0x3a   : > { %v929_v6 = vld [vmem:[%s166_s11 + $0x38] sm:$0xff]  ;;  %v197_v7 = vadd.f32 %v925_v4, %v921_v2  ;;  %v933_v8 = vld [vmem:[%s166_s11 + $0x10] sm:$0xff]  ;;  %v213_v24 = vld [vmem:[%s1017_s1] sm:$0x3]  ;;  %v779_v32 = vmov 0   ;;  %s188_s27 = scalar_lea.vmem [#allocation5], %s549_s9 }
  0x3b   : > { %v935_v9 = vld [vmem:[%s166_s11 + $0x18] sm:$0xff]  ;;  %204 = vadd.xlane.f32.xlu1 %v203_v3  ;;  %v206_v10 = vadd.f32 %v929_v6, %v927_v5  ;;  %v289_v25 = vld [vmem:[%s1018_s2] sm:$0xff]  ;;  %v290_v29 = vld [vmem:[%s1018_s2 + $0x8] sm:$0xff]  ;;  %657 = vset.pattern.permute.xlu0 %v779_v32  ;;  %s469_s28 = sshll.u32 %s188_s27, 4  ;;  %s567_s29 = sshll.u32 %s824_s16, 10  ;;  %s965_s28 = int_to_ptr.vmem [resolvable:$true] %s469_s28 }
  0x3c   : > { %198 = vadd.xlane.f32.xlu0 %v197_v7  ;;  %v200_v11 = vadd.f32 %v935_v9, %v933_v8  ;;  %591 = vmatprep.mubr.msk.f32.mxu1 %vm293_vm2, %v289_v25  ;;  %v291_v30 = vld [vmem:[%s1018_s2 + $0x10] sm:$0xff]  ;;  %v292_v31 = vld [vmem:[%s1018_s2 + $0x18] sm:$0xff]  ;;  %s970_s10 = scalar_lea.hbm %s1019_s3, %s567_s29  ;;  %s456_s16 = scalar_lea.sflag [#allocation4], %s907_s5 }
  0x3d   : > { %658 = vset.pattern.permute.xlu1 %v779_v32  ;;  %s705_s11 = scalar_lea.vmem %s965_s28, 1024  ;;  %p1026_p11 = scmp.ne.s32.totalorder %s1023_s24, 0 }
  0x3e   : > { %p706_p6 = scmp.ne.s32.totalorder %s965_s28, %s705_s11  ;;  %s780_s23 = smov [#allocation5]  }
  0x3f   : > { %207 = vadd.xlane.f32.xlu1 %v206_v10  ;;  %s709_s4 = sshll.u32 %s780_s23, 4  ;;  %s710_s4 = int_to_ptr.vmem [resolvable:$false] %s709_s4 }
  0x40   : > { %201 = vadd.xlane.f32.xlu0 %v200_v11  ;;  %p707_p12 = pnand %p706_p6, %p1026_p11  ;;  %s711_s6 = scalar_lea.vmem %s710_s4, 2048 }
  0x41   : > { %p712_p8 = scmp.lt.s32.totalorder %s965_s28, %s710_s4  ;;  %p713_p10 = scmp.lt.s32.totalorder %s711_s6, %s705_s11 }
  0x42   : > { %p708_p13 = pneg %p707_p12 }
  0x43   : > { %p714_p0 = por %p713_p10, %p712_p8 }
  0x45   : > { %p715_p2 = pnand %p714_p0, %p708_p13 }
  0xc8   : > { %v205_v14 = vpop.xlane.xlu1 %204 }
  0xc9   : > { %v199_v15 = vpop.xlane.xlu0 %198  ;;  %v211_v20 = vmul.f32 0.00390625, %v205_v14 }
  0xca   : > { %v209_v18 = vmul.f32 0.00390625, %v199_v15 }
  0xcc   : > { %v208_v16 = vpop.xlane.xlu1 %207 }
  0xcd   : > { %v202_v17 = vpop.xlane.xlu0 %201  ;;  %v212_v21 = vmul.f32 0.00390625, %v208_v16 }
  0xce   : > { %v210_v19 = vmul.f32 0.00390625, %v202_v17 }
  0xcf   : > { %v601_v23 = vpack.c.bf16 %v212_v21, %v211_v20 }
  0xd0   : > { %v598_v22 = vpack.c.bf16 %v210_v19, %v209_v18 }
  0xd2   : > { %599 = vmatpush3.bf16.msra.mxu0 %v598_v22 }
  0xd3   : > { %600 = vmatprep.subr.bf16.mxu0 %v776_v12 }
  0xd6   : > { %602 = vmatpush3.bf16.msra.mxu0 %v601_v23 }
  0xd9   : > { %587 = vmatmul.mubr.msk.f32.vlgmr.msra.gmra.mrb[0].mxu0 %vm214_vm1, %v213_v24 }
 0x1ac   : > { %v284_v26 = vpop.f32.mrb[0].mxu0 }
 0x1ad   : > { %v288_v27 = vmax.f32 %v284_v26, 0.0  ;;  %v588_v28 = vpop.f32.mrb[1].mxu0 }
 0x1af   : > { %589 = vmatprep.subr.msk.mxu1 %vm306_vm3, %v288_v27 }
 0x1b0   : > { %590 = vmatpush3.msk.msra.mxu1 %vm306_vm3, %v288_v27 }
 0x1b1   : > { %592 = vmatmul.mubr.msk.f32.vlgmr.msra.gmra.mrb[0].mxu1 %vm293_vm2, %v290_v29 }
 0x1b2   : > { %594 = vmatprep.mubr.msk.f32.mxu1 %vm293_vm2, %v291_v30 }
 0x1b5   : > { %595 = vmatmul.mubr.msk.f32.gmra.mrb[2].mxu1 %vm293_vm2, %v292_v31 }
 0x284   : > { %v593_v33 = vpop.f32.mrb[0].mxu1 }
 0x285   : > { %v558_v34 = vmul.f32 -1.442695, %v593_v33  ;;  %v376_v35 = vpop.f32.mrb[1].mxu1 }
 0x286   : > { %v557_v36 = vmul.f32 -1.442695, %v376_v35 }
 0x287   : > { %659 = vpow2.f32 %v558_v34 }
 0x288   : > { %661 = vpow2.f32 %v557_v36  ;;  %v596_v37 = vpop.f32.mrb[2].mxu1 }
 0x289   : > { %v560_v38 = vmul.f32 -1.442695, %v596_v37  ;;  %v386_v39 = vpop.f32.mrb[3].mxu1 }
 0x28a   : > { %v559_v40 = vmul.f32 -1.442695, %v386_v39 }
 0x28b   : > { %663 = vpow2.f32 %v560_v38 }
 0x28c   : > { %665 = vpow2.f32 %v559_v40 }
 0x291   : > { %v660_v41 = vpop.eup %659 }
 0x292   : > { %v662_v42 = vpop.eup %661  ;;  %v408_v43 = vadd.f32 1.0, %v660_v41 }
 0x293   : > { %v407_v44 = vadd.f32 1.0, %v662_v42 }
 0x294   : > { %667 = vrcp.f32 %v408_v43 }
 0x295   : > { %v664_v45 = vpop.eup %663  ;;  %669 = vrcp.f32 %v407_v44 }
 0x296   : > { %v666_v46 = vpop.eup %665  ;;  %v410_v48 = vadd.f32 1.0, %v664_v45 }
 0x297   : > { %v409_v47 = vadd.f32 1.0, %v666_v46 }
 0x299   : > { %671 = vrcp.f32 %v409_v47 }
 0x29a   : > { %673 = vrcp.f32 %v410_v48 }
 0x29e   : > { %v668_v49 = vpop.eup %667 }
 0x29f   : > { %v670_v50 = vpop.eup %669  ;;  %426 = vperm.xlu1 %658, %v668_v49  }
 0x2a0   : > { %421 = vperm.xlu0 %657, %v670_v50  }
 0x2a3   : > { %v672_v51 = vpop.eup %671 }
 0x2a4   : > { %431 = vperm.xlu1 %658, %v672_v51   ;;  %v674_v52 = vpop.eup %673 }
 0x2a8   : > { %436 = vperm.xlu1 %658, %v674_v52  }
 0x31e   : > { %v427_v53 = vpop.permute.xlu1 %426 }
 0x31f   : > { %v441_v54 = vmul.f32 %v427_v53, %v933_v8  ;;  %v442_v55 = vmul.f32 %v427_v53, %v935_v9  ;;  %v422_v56 = vpop.permute.xlu0 %421 }
 0x320   : > { %v439_v57 = vmul.f32 %v422_v56, %v921_v2  ;;  %v440_v58 = vmul.f32 %v422_v56, %v925_v4 }
 0x321   : > { %449 = vst [vmem:[%s188_s27 + $0x10] sm:$0xff] %v441_v54  ;;  %450 = vst [vmem:[%s188_s27 + $0x18] sm:$0xff] %v442_v55 }
 0x322   : > { %447 = vst [vmem:[%s188_s27] sm:$0xff] %v439_v57  ;;  %448 = vst [vmem:[%s188_s27 + $0x8] sm:$0xff] %v440_v58 }
 0x323   : > { %v432_v59 = vpop.permute.xlu1 %431 }
 0x324   : > { %v443_v60 = vmul.f32 %v432_v59, %v917_v0  ;;  %v444_v61 = vmul.f32 %v432_v59, %v919_v1 }
 0x326   : > { %451 = vst [vmem:[%s188_s27 + $0x20] sm:$0xff] %v443_v60  ;;  %452 = vst [vmem:[%s188_s27 + $0x28] sm:$0xff] %v444_v61 }
 0x327   : > { %v437_v62 = vpop.permute.xlu1 %436 }
 0x328   : > { %v445_v63 = vmul.f32 %v437_v62, %v927_v5  ;;  %v446_v0 = vmul.f32 %v437_v62, %v929_v6 }
 0x32a   : > { %453 = vst [vmem:[%s188_s27 + $0x30] sm:$0xff] %v445_v63  ;;  %454 = vst [vmem:[%s188_s27 + $0x38] sm:$0xff] %v446_v0 }
 0x32b   : > { %718 = shalt.err (!%p715_p2)
}
 0x32c   : > { %s719_s7 = scalar_lea.hbm %s970_s10, 1024  ;;  %s723_s19 = scalar_lea.hbm %s1019_s3, 2048 }
 0x32d   : > { %p720_p4 = scmp.ne.s32.totalorder %s970_s10, %s719_s7  ;;  %p724_p9 = scmp.lt.u32.totalorder %s970_s10, %s1019_s3 }
 0x32e   : > { %p725_p1 = scmp.lt.u32.totalorder %s723_s19, %s719_s7  ;;  %p727_p6 = scmp.lt.u32.totalorder %s719_s7, %s970_s10 }
 0x32f   : > { %p721_p5 = pnand %p720_p4, %p1026_p11 }
 0x330   : > { %p726_p3 = por %p725_p1, %p724_p9 }
 0x331   : > { %p722_p7 = pneg %p721_p5 }
 0x332   : > { %p728_p12 = por %p727_p6, %p726_p3 }
 0x334   : > { %p729_p13 = pnand %p728_p12, %p722_p7 }
 0x336   : > { %732 = shalt.err (!%p729_p13)
}
 0x337   : > { %s781_s26 = smov 256   ;;  %s782_s27 = smov 16  }
 0x338   : > { %605 = dma.vmem_to_hbm [thread:$0]  (%p1026_p11), %s965_s28, 1024, %s970_s10, %s456_s16, %s781_s26, %s781_s26, %s782_s27  }
 0x339 PF: > { %s484_s29 = sand.u32 1, %s759_s12   ;;  %p1027_p8 = scmp.ne.s32.totalorder %s1024_s25, 0 }
 0x33a   : > { %p1028_p10 = scmp.ge.s32.totalorder %s771_s15, 2  ;;  %s485_s30 = scalar_lea.sflag [#allocation4], %s484_s29 }
 0x33c   : > { %p612_p0 = pnand %p1028_p10, %p1027_p8 }
 0x33e   : > { %754 = dma.done.wait (!%p612_p0), %s485_s30, 1024  }
 0x33f   : > { %756 = vsyncadd (!%p612_p0), %s485_s30, 4294966272  ;;  %p16_p2 = scmp.ge.s32.totalorder %s828_s18, 4   ;;  %s1029_s12 = smov %s763_s13 }
 0x340   : > { %s1030_s13 = smov %s767_s14  ;;  %s1031_s14 = smov %s840_s21 }
 0x341   : > { %s1032_s15 = smov %s828_s18  ;;  %18 = sbr.rel (!%p16_p2) target bundleno = 5 (0x5), region = 77 }
 0x348   :  { %490 = vsyncpa [#allocation3], 1 }
 0x349   :  { %492 = vsyncpa [#allocation3 + $0x1], 1 }
 0x34a   :  { %493 = vsyncpa [#allocation4], 1 }
 0x34b   :  { %495 = vsyncpa [#allocation4 + $0x1], 1 }

</bundles_post_ra>
